<compile_context>
chip_gen: v7x
topology: tpu7x:2x2x1
jax: 0.10.0
libtpu: 0.0.40
codegen_flags: <defaults>
</compile_context>

<pallas_src>
import functools

import jax
import jax.numpy as jnp
from jax.experimental import pallas as pl
from jax.experimental.pallas import tpu as pltpu


# --------------------------------------------------------------------------- #
# Helpers
# --------------------------------------------------------------------------- #
def _round_up(n, m):
    return ((n + m - 1) // m) * m


def _vmem_capacity_bytes():
    """Best-effort VMEM capacity query; falls back to v7x's per-core 64 MiB."""
    try:
        info = pltpu.get_tpu_info()
        cap = getattr(info, "vmem_capacity_bytes", None)
        if cap:
            return int(cap)
    except Exception:
        pass
    return 64 << 20


def _choose_tm(m_pad, max_tm):
    """Largest power-of-two row tile <= max_tm with <= 25% padding waste."""
    for cand in (1024, 512, 256, 128, 64, 32, 16, 8):
        if cand > max_tm or cand > m_pad:
            continue
        mp = _round_up(m_pad, cand)
        if (mp - m_pad) * 4 <= mp:
            return cand, mp
    return 8, _round_up(m_pad, 8)


def _div_tile(dim, candidates):
    for c in candidates:
        if dim % c == 0:
            return c
    return 128


# ----------------------------- Pallas kernels ------------------------------- #
def _resident_w_kernel(x_ref, w_ref, b_ref, o_ref):
    """Single-pass GEMM row-tile: W is VMEM-resident (constant index_map)."""
    acc = jnp.dot(x_ref[...].astype(jnp.bfloat16),
                  w_ref[...].astype(jnp.bfloat16),
                  preferred_element_type=jnp.float32)
    o_ref[...] = (acc + b_ref[...]).astype(o_ref.dtype)


def _tiled_kernel(x_ref, w_ref, b_ref, o_ref, acc_ref):
    """K-tiled GEMM fallback (very large H): f32 scratch accumulator."""
    k = pl.program_id(2)

    @pl.when(k == 0)
    def _():
        # Fold the bias into the accumulator init (saves an extra add+store pass).
        acc_ref[...] = jnp.broadcast_to(b_ref[...], acc_ref.shape)

    acc_ref[...] += jnp.dot(x_ref[...], w_ref[...],
                            preferred_element_type=jnp.float32)

    @pl.when(k == pl.num_programs(2) - 1)
    def _():
        o_ref[...] = acc_ref[...].astype(o_ref.dtype)


# ----------------------------- GEMM wrapper --------------------------------- #
def mixed_linear_pallas(x2d, w_mix, b_mix):
    """out = x2d @ w_mix + b_mix via a single Pallas matmul.

    x2d:   [M, H]
    w_mix: [H, H] f32 (pre-mixed weights)
    b_mix: [H]    f32 (pre-mixed bias)
    Returns [M, H] in x2d.dtype.
    """
    M, H = x2d.shape
    out_dtype = x2d.dtype
    out_bytes = jnp.dtype(out_dtype).itemsize

    # Tiny problems: padding H up to 128 lanes + grid overhead loses to XLA dot.
    if H < 256 or M < 8:
        return (jnp.dot(x2d.astype(jnp.float32), w_mix) + b_mix).astype(out_dtype)

    M_pad = _round_up(M, 8)       # sublane multiple
    H_pad = _round_up(H, 128)     # lane multiple -> unmasked vst
    cap = _vmem_capacity_bytes()
    budget = (cap * 7) // 10      # headroom for Mosaic internal scratch

    b_p = b_mix.reshape(1, H).astype(jnp.float32)
    if H_pad != H:
        b_p = jnp.pad(b_p, ((0, 0), (0, H_pad - H)))

    # ---------------- Path A: W VMEM-resident, single k step ---------------- #
    w_res_bytes = 2 * (H_pad * H_pad * 2)   # bf16, double-buffer-conservative
    if w_res_bytes <= budget // 2:
        per_row = 2 * H_pad * (4 + out_bytes) + 8 * H_pad   # x(f32 worst) + out, x2 bufs
        tm_max = (budget - w_res_bytes) // per_row
        if tm_max >= 8:
            tm, M_tot = _choose_tm(M_pad, min(int(tm_max), 1024))
            # Keep >= 2 parallel blocks so both v7x TensorCores get work.
            if M_tot // tm == 1 and tm % 16 == 0:
                tm //= 2

            w_p = w_mix.astype(jnp.bfloat16)
            if H_pad != H:
                w_p = jnp.pad(w_p, ((0, H_pad - H), (0, H_pad - H)))
            if M_tot != M or H_pad != H:
                # Already paying a pad pass -> also pre-cast x to bf16.
                x_p = jnp.pad(x2d, ((0, M_tot - M), (0, H_pad - H))).astype(jnp.bfloat16)
            else:
                x_p = x2d   # cast to bf16 per-tile inside the kernel (no extra HBM pass)

            x_item = jnp.dtype(x_p.dtype).itemsize
            flops = 2 * M_tot * H_pad * H_pad
            est_bytes = (M_tot * H_pad * x_item + H_pad * H_pad * 2
                         + H_pad * 4 + M_tot * H_pad * out_bytes)
            vmem_limit = int(min(max(w_res_bytes + tm * per_row + (4 << 20), 32 << 20),
                                 cap - (2 << 20)))

            out = pl.pallas_call(
                _resident_w_kernel,
                out_shape=jax.ShapeDtypeStruct((M_tot, H_pad), out_dtype),
                grid_spec=pltpu.PrefetchScalarGridSpec(
                    num_scalar_prefetch=0,
                    grid=(M_tot // tm,),
                    in_specs=[
                        pl.BlockSpec((tm, H_pad), lambda i: (i, 0)),       # x rows
                        pl.BlockSpec((H_pad, H_pad), lambda i: (0, 0)),    # resident W
                        pl.BlockSpec((1, H_pad), lambda i: (0, 0)),        # bias
                    ],
                    out_specs=pl.BlockSpec((tm, H_pad), lambda i: (i, 0)),
                ),
                compiler_params=pltpu.CompilerParams(
                    dimension_semantics=("parallel",),
                    vmem_limit_bytes=vmem_limit),
                cost_estimate=pl.CostEstimate(
                    flops=int(flops), transcendentals=0,
                    bytes_accessed=int(est_bytes)),
            )(x_p, w_p, b_p)

            if M_tot != M or H_pad != H:
                out = out[:M, :H]
            return out

    # ---------------- Path B: K-tiled fallback (very large H) --------------- #
    tn = _div_tile(H_pad, (1024, 512, 256, 128))
    tk = _div_tile(H_pad, (2048, 1024, 512, 256, 128))
    tm, M_tot = _choose_tm(M_pad, 1024)

    def _est(tm_, tn_, tk_):
        return (2 * tm_ * tk_ * 2            # x tiles (bf16, double-buffered)
                + 2 * tk_ * tn_ * 2          # W tiles
                + 2 * tn_ * 4                # bias
                + 2 * tm_ * tn_ * out_bytes  # output tiles
                + tm_ * tn_ * 4)             # f32 accumulator scratch

    while _est(tm, tn, tk) > budget and (tk > 128 or tn > 128 or tm > 8):
        if tk > 128 and tk >= tn and tk >= tm:
            tk //= 2
        elif tn > 128 and tn >= tm:
            tn //= 2
        elif tm > 8:
            tm = max(tm // 2, 8)
        else:
            break
    M_tot = _round_up(M, tm)

    x_p = x2d
    if M_tot != M or H_pad != H:
        x_p = jnp.pad(x2d, ((0, M_tot - M), (0, H_pad - H)))
    x_p = x_p.astype(jnp.bfloat16)           # x/W are re-streamed: pre-cast pays here
    w_p = w_mix.astype(jnp.bfloat16)
    if H_pad != H:
        w_p = jnp.pad(w_p, ((0, H_pad - H), (0, H_pad - H)))

    grid = (M_tot // tm, H_pad // tn, H_pad // tk)
    flops = 2 * M_tot * H_pad * H_pad
    est_bytes = (M_tot * H_pad * 2 * (H_pad // tn)
                 + H_pad * H_pad * 2 * (M_tot // tm)
                 + H_pad * 4 + M_tot * H_pad * out_bytes)
    vmem_limit = int(min(max(_est(tm, tn, tk) + (4 << 20), 32 << 20),
                         cap - (2 << 20)))

    out = pl.pallas_call(
        _tiled_kernel,
        out_shape=jax.ShapeDtypeStruct((M_tot, H_pad), out_dtype),
        grid_spec=pltpu.PrefetchScalarGridSpec(
            num_scalar_prefetch=0,
            grid=grid,
            in_specs=[
                pl.BlockSpec((tm, tk), lambda i, j, k: (i, k)),   # x tile
                pl.BlockSpec((tk, tn), lambda i, j, k: (k, j)),   # W tile
                pl.BlockSpec((1, tn), lambda i, j, k: (0, j)),    # bias tile
            ],
            out_specs=pl.BlockSpec((tm, tn), lambda i, j, k: (i, j)),
            scratch_shapes=[pltpu.VMEM((tm, tn), jnp.float32)],
        ),
        compiler_params=pltpu.CompilerParams(
            dimension_semantics=("parallel", "parallel", "arbitrary"),
            vmem_limit_bytes=vmem_limit),
        cost_estimate=pl.CostEstimate(
            flops=int(flops), transcendentals=0, bytes_accessed=int(est_bytes)),
    )(x_p, w_p, b_p)

    if M_tot != M or H_pad != H:
        out = out[:M, :H]
    return out


# --------------------------- Module-level wrapper --------------------------- #
def mixed_operation_transformer_forward(params, x, temperature,
                                        latency_to_accumulate, gumbel_key):
    """Reproduces MixedOperationTransformer.forward semantics.

    params: dict with 'thetas' [n_ops], 'weights' [n_ops,H,H], 'biases' [n_ops,H],
            'latency' [n_ops].
    x: [B, S, H].
    Returns (output [B,S,H], latency_to_accumulate scalar).
    """
    thetas = params["thetas"]
    # nn.functional.gumbel_softmax(thetas, tau) defaults to hard=False -> soft mix.
    gumbel = jax.random.gumbel(gumbel_key, thetas.shape, dtype=thetas.dtype)
    soft_mask = jax.nn.softmax((thetas + gumbel) / temperature)

    # All candidate ops here are dense linears, so
    #   sum_k m_k (x @ W_k + b_k) == x @ (sum_k m_k W_k) + sum_k m_k b_k.
    # Pre-mix once in f32 (tiny), then run a single lane-dense matmul kernel.
    # TODO(synk): arbitrary non-linear candidate ops (e.g. full MHSA blocks from
    # `proposed_operations`) cannot be pre-mixed; they would need a per-op path.
    w_mix = jnp.einsum("k,kij->ij", soft_mask, params["weights"])
    b_mix = jnp.einsum("k,kj->j", soft_mask, params["biases"])

    B, S, H = x.shape
    out2d = mixed_linear_pallas(x.reshape(B * S, H), w_mix, b_mix)
    output = out2d.reshape(B, S, H)

    latency = jnp.sum(soft_mask * params["latency"])
    return output, latency_to_accumulate + latency


# ------------------------------ Param init ---------------------------------- #
def init_params(key, n_ops, hidden):
    k_theta, k_w, k_b = jax.random.split(key, 3)
    thetas = jnp.full((n_ops,), 1.0 / n_ops, dtype=jnp.float32)   # as in __init__
    weights = jax.random.normal(k_w, (n_ops, hidden, hidden), jnp.float32) * 0.05
    biases = jax.random.normal(k_b, (n_ops, hidden), jnp.float32) * 0.01
    latency = jnp.array([1.0 + 0.5 * i for i in range(n_ops)], jnp.float32)
    return {"thetas": thetas, "weights": weights, "biases": biases,
            "latency": latency}


if __name__ == "__main__":
    key = jax.random.PRNGKey(0)
    k_params, k_x, k_gumbel, k_params2, k_x2 = jax.random.split(key, 5)

    temperature = jnp.float32(5.0)
    lat0 = jnp.float32(0.0)
    N_OPS = 3

    # --- Pallas (W-resident) path: H large enough for lane-dense tiles ------ #
    B, S, H = 2, 64, 256
    params = init_params(k_params, N_OPS, H)
    x = jax.random.normal(k_x, (B, S, H), jnp.float32)

    fwd = jax.jit(functools.partial(mixed_operation_transformer_forward, params))
    out, lat = fwd(x, temperature, lat0, k_gumbel)
    jax.block_until_ready((out, lat))

    gumbel = jax.random.gumbel(k_gumbel, params["thetas"].shape, jnp.float32)
    m = jax.nn.softmax((params["thetas"] + gumbel) / temperature)
    ref = sum(m[k] * (x @ params["weights"][k] + params["biases"][k])
              for k in range(N_OPS))
    # bf16 MXU operands -> allow ~2e-2 tolerance vs the pure-f32 reference.
    assert jnp.allclose(out, ref, atol=2e-2, rtol=2e-2), "Pallas path mismatch"
    assert jnp.allclose(lat, jnp.sum(m * params["latency"]), atol=1e-5)

    # --- Tiny-H path (H=32): bypasses Pallas (pad 32->128 would dominate) --- #
    B2, S2, H2 = 2, 8, 32
    params2 = init_params(k_params2, N_OPS, H2)
    x2 = jax.random.normal(k_x2, (B2, S2, H2), jnp.float32)
    fwd2 = jax.jit(functools.partial(mixed_operation_transformer_forward, params2))
    out2, lat2 = fwd2(x2, temperature, lat0, k_gumbel)
    jax.block_until_ready((out2, lat2))

    gumbel2 = jax.random.gumbel(k_gumbel, params2["thetas"].shape, jnp.float32)
    m2 = jax.nn.softmax((params2["thetas"] + gumbel2) / temperature)
    ref2 = sum(m2[k] * (x2 @ params2["weights"][k] + params2["biases"][k])
               for k in range(N_OPS))
    assert jnp.allclose(out2, ref2, atol=1e-4, rtol=1e-4), "bypass path mismatch"

    print("KERNEL_OK")
</pallas_src>

<mosaic_0001>
module attributes {stable_mosaic.version = 11 : i64} {
  func.func @_resident_w_kernel(%arg0: i32, %arg1: memref<64x256xf32, #tpu.memory_space<vmem>>, %arg2: memref<256x256xbf16, #tpu.memory_space<vmem>>, %arg3: memref<1x256xf32, #tpu.memory_space<vmem>>, %arg4: memref<64x256xf32, #tpu.memory_space<vmem>>) attributes {dimension_semantics = [#tpu.dimension_semantics<parallel>], iteration_bounds = array<i64: 2>, scalar_prefetch = 0 : i64, scratch_operands = 0 : i64, tpu.core_type = #tpu.core_type<tc>, window_params = [{transform_indices = @transform_0, window_bounds = array<i64: 64, 256>}, {pipeline_mode = #tpu.pipeline_mode<synchronous>, transform_indices = @transform_1, window_bounds = array<i64: 256, 256>}, {pipeline_mode = #tpu.pipeline_mode<synchronous>, transform_indices = @transform_2, window_bounds = array<i64: 1, 256>}, {transform_indices = @transform_3, window_bounds = array<i64: 64, 256>}]} {
    %c0 = arith.constant 0 : index
    %c0_0 = arith.constant 0 : index
    %0 = vector.load %arg1[%c0, %c0_0] : memref<64x256xf32, #tpu.memory_space<vmem>>, vector<64x256xf32>
    %1 = arith.truncf %0 : vector<64x256xf32> to vector<64x256xbf16>
    %c0_1 = arith.constant 0 : index
    %c0_2 = arith.constant 0 : index
    %2 = vector.load %arg2[%c0_1, %c0_2] : memref<256x256xbf16, #tpu.memory_space<vmem>>, vector<256x256xbf16>
    %cst = arith.constant dense<0.000000e+00> : vector<64x256xf32>
    %3 = tpu.matmul %1, %2, %cst {dimension_numbers = #tpu.dot_dimension_numbers<[1], [0], [0], [1], [0, 0, 1, 1], [], []>} : vector<64x256xbf16>, vector<256x256xbf16>, vector<64x256xf32> -> vector<64x256xf32>
    %c0_3 = arith.constant 0 : index
    %c0_4 = arith.constant 0 : index
    %4 = vector.load %arg3[%c0_3, %c0_4] : memref<1x256xf32, #tpu.memory_space<vmem>>, vector<1x256xf32>
    %5 = vector.broadcast %4 : vector<1x256xf32> to vector<64x256xf32>
    %6 = arith.addf %3, %5 : vector<64x256xf32>
    %c0_5 = arith.constant 0 : index
    %c0_6 = arith.constant 0 : index
    %7 = vector.load %arg4[%c0_5, %c0_6] : memref<64x256xf32, #tpu.memory_space<vmem>>, vector<64x256xf32>
    tpu.vector_store %arg4[%c0_5, %c0_6], %6 {strides = array<i32>} : memref<64x256xf32, #tpu.memory_space<vmem>>, vector<64x256xf32>,
    return
  }
  func.func @transform_0(%arg0: i32) -> (i32, i32) {
    %c0_i32 = arith.constant 0 : i32
    %c0_i32_0 = arith.constant 0 : i32
    return %arg0, %c0_i32 : i32, i32
  }
  func.func @transform_1(%arg0: i32) -> (i32, i32) {
    %c0_i32 = arith.constant 0 : i32
    %c0_i32_0 = arith.constant 0 : i32
    %c0_i32_1 = arith.constant 0 : i32
    return %c0_i32, %c0_i32_0 : i32, i32
  }
  func.func @transform_2(%arg0: i32) -> (i32, i32) {
    %c0_i32 = arith.constant 0 : i32
    %c0_i32_0 = arith.constant 0 : i32
    %c0_i32_1 = arith.constant 0 : i32
    return %c0_i32, %c0_i32_0 : i32, i32
  }
  func.func @transform_3(%arg0: i32) -> (i32, i32) {
    %c0_i32 = arith.constant 0 : i32
    %c0_i32_0 = arith.constant 0 : i32
    return %arg0, %c0_i32 : i32, i32
  }
}

</mosaic_0001>

<bundles_post_ra>
// kernel: mixed_operation_transformer_forward.1
= control target key start
LH: loop header
LB: loop body
LE: loop exit
PB: predicated region body
PF: predicated region fallthrough
CT: control target
= control target key end

     0   :  { %8 = vsyncpa [#allocation3], 0  ;;  %s1068_s0 = inlined_call_operand.vmem [shape: f32[128,256], index: 0, kind: input, shape index: {}]   ;;  %s1069_s1 = inlined_call_operand.vmem [shape: bf16[256,256], index: 1, kind: input, shape index: {}]   ;;  %s1070_s2 = inlined_call_operand.vmem [shape: f32[1,256], index: 2, kind: input, shape index: {}]   ;;  %s1071_s3 = inlined_call_operand.hbm [shape: f32[128,256], index: 3, kind: output, shape index: {}]  }
   0x1   :  { %10 = vsyncpa [#allocation3 + $0x1], 0  ;;  %s826_s12 = smov 0   ;;  %s828_s13 = smov 0  }
   0x2   :  { %s830_s14 = smov 0   ;;  %s832_s15 = smov 0  }
   0x3 LB: > { %s847_s16 = sadd.s32 4294967295, %s801_s15   ;;  %s569_s17 = sadd.s32 4294967294, %s801_s15   ;;  %s801_s15 = sphi %s832_s15, %s1077_s15   ;;  %s797_s14 = sphi %s830_s14, %s1076_s14   ;;  %s793_s13 = sphi %s828_s13, %s1075_s13   ;;  %s789_s12 = sphi %s826_s12, %s1074_s12  }
   0x4   : > { %s851_s18 = sadd.s32 1, %s801_s15   ;;  %s91_s19 = sadd.s32 1, %s797_s14 }
   0x5   : > { %s88_s20 = ssub.s32 %s801_s15, %s851_s18  ;;  %p101_p0 = scmp.ne.s32.totalorder %s797_s14, %s793_s13 }
   0x6   : > { %p89_p1 = scmp.eq.s32.totalorder %s88_s20, 0  ;;  %p102_p2 = scmp.eq.s32.totalorder %s847_s16, 1 }
   0x7   : > { %p107_p3 = scmp.ne.s32.totalorder %s793_s13, %s789_s12  ;;  %p108_p4 = scmp.eq.s32.totalorder %s569_s17, 1 }
   0x8   : > { %s862_s21 = scalar_select %p89_p1, %s797_s14, %s91_s19  }
   0x9   : > { %p864_p5 = por %p102_p2, %p101_p0  ;;  %p868_p6 = por %p108_p4, %p107_p3 }
   0xa   : > { %p572_p7 = scmp.ge.s32.totalorder %s801_s15, 1  ;;  %p142_p8 = scmp.lt.s32.totalorder %s801_s15, 3 }
   0xc   : > { %p143_p9 = pnand %p572_p7, %p142_p8 }
   0xd   : > { %v691_v0 = vld [vmem:[%s1069_s1 + $0x4] ss:$8 sps:$4 sm:$0xff] (!%p143_p9)   ;;  %v693_v1 = vld [vmem:[%s1069_s1] ss:$8 sps:$4 sm:$0xff] (!%p143_p9)   ;;  %v694_v2 = vld [vmem:[%s1069_s1 + $0x14] ss:$8 sps:$4 sm:$0xff] (!%p143_p9)   ;;  %v233_v56 = vlaneseq (!%p143_p9) }
   0xe   : > { %146 = sbr.rel (%p143_p9) target bundleno = 318 (0x13e), region = 32  ;;  %403 = vmatprep.subr.bf16.mxu0 (!%p143_p9), %v691_v0  ;;  %618 = vmatprep.subr.bf16.mxu1 (!%p143_p9), %v691_v0  ;;  %v696_v3 = vld [vmem:[%s1069_s1 + $0x10] ss:$8 sps:$4 sm:$0xff] (!%p143_p9)   ;;  %v697_v4 = vld [vmem:[%s1069_s1 + $0x24] ss:$8 sps:$4 sm:$0xff] (!%p143_p9)   ;;  %s574_s7 = sshll.u32 (!%p143_p9), %s847_s16, 3 }
   0xf   : > { %404 = vmatpush1.bf16.msra.mxu0 (!%p143_p9), %v693_v1  ;;  %634 = vmatpush1.bf16.msra.mxu1 (!%p143_p9), %v693_v1  ;;  %v699_v5 = vld [vmem:[%s1069_s1 + $0x20] ss:$8 sps:$4 sm:$0xff] (!%p143_p9)   ;;  %p168_p10 = scmp.lt.s32.totalorder (!%p143_p9), %s574_s7, 15  ;;  %v700_v6 = vld [vmem:[%s1069_s1 + $0x34] ss:$8 sps:$4 sm:$0xff] (!%p143_p9)   ;;  %v234_v57 = vshrl.u32 (!%p143_p9), %v233_v56, 7 }
  0x10   : > { %405 = vmatprep.subr.bf16.mxu0 (!%p143_p9), %v694_v2  ;;  %619 = vmatprep.subr.bf16.mxu1 (!%p143_p9), %v694_v2  ;;  %v702_v7 = vld [vmem:[%s1069_s1 + $0x30] ss:$8 sps:$4 sm:$0xff] (!%p143_p9)   ;;  %v703_v8 = vld [vmem:[%s1069_s1 + $0x44] ss:$8 sps:$4 sm:$0xff] (!%p143_p9)   ;;  %v705_v9 = vld [vmem:[%s1069_s1 + $0x40] ss:$8 sps:$4 sm:$0xff] (!%p143_p9)  }
  0x11   : > { %v706_v10 = vld [vmem:[%s1069_s1 + $0x54] ss:$8 sps:$4 sm:$0xff] (!%p143_p9)   ;;  %v708_v11 = vld [vmem:[%s1069_s1 + $0x50] ss:$8 sps:$4 sm:$0xff] (!%p143_p9)   ;;  %v709_v12 = vld [vmem:[%s1069_s1 + $0x64] ss:$8 sps:$4 sm:$0xff] (!%p143_p9)  }
  0x12   : > { %v711_v18 = vld [vmem:[%s1069_s1 + $0x60] ss:$8 sps:$4 sm:$0xff] (!%p143_p9)   ;;  %v712_v20 = vld [vmem:[%s1069_s1 + $0x74] ss:$8 sps:$4 sm:$0xff] (!%p143_p9)   ;;  %v714_v21 = vld [vmem:[%s1069_s1 + $0x70] ss:$8 sps:$4 sm:$0xff] (!%p143_p9)  }
  0x13   : > { %406 = vmatpush1.bf16.msra.mxu0 (!%p143_p9), %v696_v3  ;;  %635 = vmatpush1.bf16.msra.mxu1 (!%p143_p9), %v696_v3  ;;  %v715_v22 = vld [vmem:[%s1069_s1 + $0x84] ss:$8 sps:$4 sm:$0xff] (!%p143_p9)   ;;  %v717_v23 = vld [vmem:[%s1069_s1 + $0x80] ss:$8 sps:$4 sm:$0xff] (!%p143_p9)   ;;  %v718_v24 = vld [vmem:[%s1069_s1 + $0x94] ss:$8 sps:$4 sm:$0xff] (!%p143_p9)  }
  0x14   : > { %407 = vmatprep.subr.bf16.mxu0 (!%p143_p9), %v697_v4  ;;  %620 = vmatprep.subr.bf16.mxu1 (!%p143_p9), %v697_v4  ;;  %v720_v25 = vld [vmem:[%s1069_s1 + $0x90] ss:$8 sps:$4 sm:$0xff] (!%p143_p9)   ;;  %v721_v26 = vld [vmem:[%s1069_s1 + $0xa4] ss:$8 sps:$4 sm:$0xff] (!%p143_p9)   ;;  %v723_v27 = vld [vmem:[%s1069_s1 + $0xa0] ss:$8 sps:$4 sm:$0xff] (!%p143_p9)  }
  0x15   : > { %s1079_s7 = smov (!%p168_p10, %s574_s7), 15  ;;  %v724_v28 = vld [vmem:[%s1069_s1 + $0xb4] ss:$8 sps:$4 sm:$0xff]   ;;  %v726_v29 = vld [vmem:[%s1069_s1 + $0xb0] ss:$8 sps:$4 sm:$0xff]   ;;  %v235_v58 = vsub.s32 0, %v234_v57 }
  0x16   : > { %s615_s27 = sshll.u32 %s1079_s7, 4  ;;  %v727_v30 = vld [vmem:[%s1069_s1 + $0xc4] ss:$8 sps:$4 sm:$0xff]   ;;  %v729_v31 = vld [vmem:[%s1069_s1 + $0xc0] ss:$8 sps:$4 sm:$0xff]   ;;  %s164_s20 = sand.u32 1, %s793_s13  }
  0x17   : > { %408 = vmatpush1.bf16.msra.mxu0 %v699_v5  ;;  %636 = vmatpush1.bf16.msra.mxu1 %v699_v5  ;;  %s911_s5 = scalar_lea.vmem %s1068_s0, %s615_s27  ;;  %v730_v32 = vld [vmem:[%s1069_s1 + $0xd4] ss:$8 sps:$4 sm:$0xff]   ;;  %v732_v33 = vld [vmem:[%s1069_s1 + $0xd0] ss:$8 sps:$4 sm:$0xff]   ;;  %v733_v34 = vld [vmem:[%s1069_s1 + $0xe4] ss:$8 sps:$4 sm:$0xff]  }
  0x18   : > { %409 = vmatprep.subr.bf16.mxu0 %v700_v6  ;;  %621 = vmatprep.subr.bf16.mxu1 %v700_v6  ;;  %v176_v13 = vld [vmem:[%s911_s5 + $0x8] sm:$0xff]  ;;  %v178_v14 = vld [vmem:[%s911_s5 + $0x18] sm:$0xff]  ;;  %v175_v38 = vld [vmem:[%s911_s5] sm:$0xff]  ;;  %v239_v60 = vsub.s32 1, %v234_v57  ;;  %s573_s26 = sshll.u32 %s164_s20, 7  ;;  %s617_s27 = sshll.u32 %s847_s16, 11 }
  0x19   : > { %v192_v15 = vpack.c.bf16 %v178_v14, %v176_v13  ;;  %v184_v16 = vld [vmem:[%s911_s5 + $0x48] sm:$0xff]  ;;  %v186_v17 = vld [vmem:[%s911_s5 + $0x58] sm:$0xff]  ;;  %v177_v39 = vld [vmem:[%s911_s5 + $0x10] sm:$0xff]  ;;  %s1015_s30 = scalar_lea.hbm %s1071_s3, %s617_s27  ;;  %s1027_s4 = scalar_lea.sflag [#allocation3], %s164_s20 }
  0x1a   : > { %v196_v19 = vpack.c.bf16 %v186_v17, %v184_v16  ;;  %v735_v35 = vld [vmem:[%s1069_s1 + $0xe0] ss:$8 sps:$4 sm:$0xff]   ;;  %v736_v36 = vld [vmem:[%s1069_s1 + $0xf4] ss:$8 sps:$4 sm:$0xff]   ;;  %v738_v37 = vld [vmem:[%s1069_s1 + $0xf0] ss:$8 sps:$4 sm:$0xff]   ;;  %v191_v46 = vpack.c.bf16 %v177_v39, %v175_v38 }
  0x1b   : > { %410 = vmatpush1.bf16.msra.mxu0 %v702_v7  ;;  %637 = vmatpush1.bf16.msra.mxu1 %v702_v7  ;;  %v183_v40 = vld [vmem:[%s911_s5 + $0x40] sm:$0xff]  ;;  %v185_v41 = vld [vmem:[%s911_s5 + $0x50] sm:$0xff]  ;;  %v180_v42 = vld [vmem:[%s911_s5 + $0x28] sm:$0xff]  ;;  %s803_s8 = smov [#allocation2]  }
  0x1c   : > { %411 = vmatprep.subr.bf16.mxu0 %v703_v8  ;;  %622 = vmatprep.subr.bf16.mxu1 %v703_v8  ;;  %v182_v43 = vld [vmem:[%s911_s5 + $0x38] sm:$0xff]  ;;  %v188_v44 = vld [vmem:[%s911_s5 + $0x68] sm:$0xff]  ;;  %v195_v47 = vpack.c.bf16 %v185_v41, %v183_v40  ;;  %v179_v50 = vld [vmem:[%s911_s5 + $0x20] sm:$0xff]  ;;  %s743_s7 = sshll.u32 %s803_s8, 4  ;;  %s744_s7 = int_to_ptr.vmem [resolvable:$false] %s743_s7 }
  0x1d   : > { %435 = vmatprep.mubr.bf16.mxu0 %v192_v15  ;;  %455 = vmatprep.mubr.bf16.mxu1 %v196_v19  ;;  %v190_v45 = vld [vmem:[%s911_s5 + $0x78] sm:$0xff]  ;;  %v194_v48 = vpack.c.bf16 %v182_v43, %v180_v42  ;;  %v181_v51 = vld [vmem:[%s911_s5 + $0x30] sm:$0xff]  ;;  %v187_v52 = vld [vmem:[%s911_s5 + $0x60] sm:$0xff]  ;;  %s745_s9 = scalar_lea.vmem %s744_s7, 4096 }
  0x1e   : > { %v198_v49 = vpack.c.bf16 %v190_v45, %v188_v44  ;;  %v189_v53 = vld [vmem:[%s911_s5 + $0x70] sm:$0xff]  ;;  %v193_v54 = vpack.c.bf16 %v181_v51, %v179_v50  ;;  %v231_v59 = vld [vmem:[%s1070_s2] sm:$0x3]  ;;  %s998_s5 = scalar_lea.vmem [#allocation2], %s573_s26 }
  0x1f   : > { %412 = vmatpush1.bf16.msra.mxu0 %v705_v9  ;;  %638 = vmatpush1.bf16.msra.mxu1 %v705_v9  ;;  %v197_v55 = vpack.c.bf16 %v189_v53, %v187_v52  ;;  %v236_v61 = vrot.slane %v231_v59, %v235_v58  ;;  %v240_v62 = vrot.slane %v231_v59, %v239_v60  ;;  %s507_s28 = sshll.u32 %s998_s5, 4  ;;  %s1017_s28 = int_to_ptr.vmem [resolvable:$true] %s507_s28 }
  0x20   : > { %413 = vmatprep.subr.bf16.mxu0 %v706_v10  ;;  %623 = vmatprep.subr.bf16.mxu1 %v706_v10  ;;  %s739_s6 = scalar_lea.vmem %s1017_s28, 2048  ;;  %p746_p0 = scmp.lt.s32.totalorder %s1017_s28, %s744_s7 }
  0x21   : > { %p740_p11 = scmp.ne.s32.totalorder %s1017_s28, %s739_s6  ;;  %p747_p1 = scmp.lt.s32.totalorder %s745_s9, %s739_s6 }
  0x23   : > { %414 = vmatpush1.bf16.msra.mxu0 %v708_v11  ;;  %639 = vmatpush1.bf16.msra.mxu1 %v708_v11  ;;  %p741_p12 = pnand %p740_p11, %p864_p5  ;;  %p748_p2 = por %p747_p1, %p746_p0 }
  0x24   : > { %415 = vmatprep.subr.bf16.mxu0 %v709_v12  ;;  %624 = vmatprep.subr.bf16.mxu1 %v709_v12 }
  0x25   : > { %p742_p13 = pneg %p741_p12 }
  0x27   : > { %416 = vmatpush1.bf16.msra.mxu0 %v711_v18  ;;  %640 = vmatpush1.bf16.msra.mxu1 %v711_v18  ;;  %p749_p3 = pnand %p748_p2, %p742_p13 }
  0x28   : > { %417 = vmatprep.subr.bf16.mxu0 %v712_v20  ;;  %625 = vmatprep.subr.bf16.mxu1 %v712_v20 }
  0x2b   : > { %418 = vmatpush1.bf16.msra.mxu0 %v714_v21  ;;  %641 = vmatpush1.bf16.msra.mxu1 %v714_v21 }
  0x2c   : > { %419 = vmatprep.subr.bf16.mxu0 %v715_v22  ;;  %626 = vmatprep.subr.bf16.mxu1 %v715_v22 }
  0x2f   : > { %420 = vmatpush1.bf16.msra.mxu0 %v717_v23  ;;  %642 = vmatpush1.bf16.msra.mxu1 %v717_v23 }
  0x30   : > { %421 = vmatprep.subr.bf16.mxu0 %v718_v24  ;;  %627 = vmatprep.subr.bf16.mxu1 %v718_v24 }
  0x33   : > { %422 = vmatpush1.bf16.msra.mxu0 %v720_v25  ;;  %643 = vmatpush1.bf16.msra.mxu1 %v720_v25 }
  0x34   : > { %423 = vmatprep.subr.bf16.mxu0 %v721_v26  ;;  %628 = vmatprep.subr.bf16.mxu1 %v721_v26 }
  0x37   : > { %424 = vmatpush1.bf16.msra.mxu0 %v723_v27  ;;  %644 = vmatpush1.bf16.msra.mxu1 %v723_v27 }
  0x38   : > { %425 = vmatprep.subr.bf16.mxu0 %v724_v28  ;;  %629 = vmatprep.subr.bf16.mxu1 %v724_v28 }
  0x3b   : > { %426 = vmatpush1.bf16.msra.mxu0 %v726_v29  ;;  %645 = vmatpush1.bf16.msra.mxu1 %v726_v29 }
  0x3c   : > { %427 = vmatprep.subr.bf16.mxu0 %v727_v30  ;;  %630 = vmatprep.subr.bf16.mxu1 %v727_v30 }
  0x3f   : > { %428 = vmatpush1.bf16.msra.mxu0 %v729_v31  ;;  %646 = vmatpush1.bf16.msra.mxu1 %v729_v31 }
  0x40   : > { %429 = vmatprep.subr.bf16.mxu0 %v730_v32  ;;  %631 = vmatprep.subr.bf16.mxu1 %v730_v32 }
  0x43   : > { %430 = vmatpush1.bf16.msra.mxu0 %v732_v33  ;;  %647 = vmatpush1.bf16.msra.mxu1 %v732_v33 }
  0x44   : > { %431 = vmatprep.subr.bf16.mxu0 %v733_v34  ;;  %632 = vmatprep.subr.bf16.mxu1 %v733_v34 }
  0x47   : > { %432 = vmatpush1.bf16.msra.mxu0 %v735_v35  ;;  %648 = vmatpush1.bf16.msra.mxu1 %v735_v35 }
  0x48   : > { %433 = vmatprep.subr.bf16.mxu0 %v736_v36  ;;  %633 = vmatprep.subr.bf16.mxu1 %v736_v36 }
  0x4b   : > { %434 = vmatpush1.bf16.msra.mxu0 %v738_v37  ;;  %649 = vmatpush1.bf16.msra.mxu1 %v738_v37 }
  0x4e   : > { %436 = vmatmul.mubr.bf16.vlgmr.msra.gmra.mrb[0].mxu0 %v191_v46  ;;  %456 = vmatmul.mubr.bf16.vlgmr.msra.gmra.mrb[0].mxu1 %v195_v47 }
  0x4f   : > { %445 = vmatprep.mubr.bf16.mxu0 %v194_v48  ;;  %465 = vmatprep.mubr.bf16.mxu1 %v198_v49 }
  0x56   : > { %446 = vmatmul.mubr.bf16.gmra.mrb[4].mxu0 %v193_v54  ;;  %466 = vmatmul.mubr.bf16.gmra.mrb[4].mxu1 %v197_v55 }
 0x121   : > { %v437_v63 = vpop.f32.mrb[0].mxu0  ;;  %v457_v0 = vpop.f32.mrb[0].mxu1 }
 0x122   : > { %v438_v1 = vadd.f32 %v437_v63, %v236_v61  ;;  %v458_v2 = vadd.f32 %v457_v0, %v236_v61  ;;  %v439_v3 = vpop.f32.mrb[1].mxu0  ;;  %v459_v4 = vpop.f32.mrb[1].mxu1 }
 0x123   : > { %v440_v5 = vadd.f32 %v439_v3, %v240_v62  ;;  %v460_v6 = vadd.f32 %v459_v4, %v240_v62  ;;  %v441_v7 = vpop.f32.mrb[2].mxu0  ;;  %v461_v8 = vpop.f32.mrb[2].mxu1 }
 0x124   : > { %476 = vst [vmem:[%s998_s5] sm:$0xff] %v438_v1  ;;  %484 = vst [vmem:[%s998_s5 + $0x40] sm:$0xff] %v458_v2  ;;  %v442_v9 = vadd.f32 %v441_v7, %v236_v61  ;;  %v462_v10 = vadd.f32 %v461_v8, %v236_v61  ;;  %v443_v11 = vpop.f32.mrb[3].mxu0  ;;  %v463_v12 = vpop.f32.mrb[3].mxu1 }
 0x125   : > { %477 = vst [vmem:[%s998_s5 + $0x8] sm:$0xff] %v440_v5  ;;  %485 = vst [vmem:[%s998_s5 + $0x48] sm:$0xff] %v460_v6  ;;  %v444_v13 = vadd.f32 %v443_v11, %v240_v62  ;;  %v464_v14 = vadd.f32 %v463_v12, %v240_v62 }
 0x126   : > { %478 = vst [vmem:[%s998_s5 + $0x10] sm:$0xff] %v442_v9  ;;  %486 = vst [vmem:[%s998_s5 + $0x50] sm:$0xff] %v462_v10 }
 0x127   : > { %479 = vst [vmem:[%s998_s5 + $0x18] sm:$0xff] %v444_v13  ;;  %487 = vst [vmem:[%s998_s5 + $0x58] sm:$0xff] %v464_v14 }
 0x129   : > { %v447_v15 = vpop.f32.mrb[4].mxu0  ;;  %v467_v16 = vpop.f32.mrb[4].mxu1 }
 0x12a   : > { %v448_v17 = vadd.f32 %v447_v15, %v236_v61  ;;  %v468_v18 = vadd.f32 %v467_v16, %v236_v61  ;;  %v449_v19 = vpop.f32.mrb[5].mxu0  ;;  %v469_v20 = vpop.f32.mrb[5].mxu1 }
 0x12b   : > { %v450_v21 = vadd.f32 %v449_v19, %v240_v62  ;;  %v470_v22 = vadd.f32 %v469_v20, %v240_v62  ;;  %v451_v23 = vpop.f32.mrb[6].mxu0  ;;  %v471_v24 = vpop.f32.mrb[6].mxu1 }
 0x12c   : > { %480 = vst [vmem:[%s998_s5 + $0x20] sm:$0xff] %v448_v17  ;;  %488 = vst [vmem:[%s998_s5 + $0x60] sm:$0xff] %v468_v18  ;;  %v452_v25 = vadd.f32 %v451_v23, %v236_v61  ;;  %v472_v26 = vadd.f32 %v471_v24, %v236_v61  ;;  %v453_v27 = vpop.f32.mrb[7].mxu0  ;;  %v473_v28 = vpop.f32.mrb[7].mxu1 }
 0x12d   : > { %481 = vst [vmem:[%s998_s5 + $0x28] sm:$0xff] %v450_v21  ;;  %489 = vst [vmem:[%s998_s5 + $0x68] sm:$0xff] %v470_v22  ;;  %v454_v29 = vadd.f32 %v453_v27, %v240_v62  ;;  %v474_v30 = vadd.f32 %v473_v28, %v240_v62 }
 0x12e   : > { %482 = vst [vmem:[%s998_s5 + $0x30] sm:$0xff] %v452_v25  ;;  %490 = vst [vmem:[%s998_s5 + $0x70] sm:$0xff] %v472_v26 }
 0x12f   : > { %483 = vst [vmem:[%s998_s5 + $0x38] sm:$0xff] %v454_v29  ;;  %491 = vst [vmem:[%s998_s5 + $0x78] sm:$0xff] %v474_v30 }
 0x130   : > { %752 = shalt.err (!%p749_p3)
}
 0x131   : > { %s753_s10 = scalar_lea.hbm %s1015_s30, 2048  ;;  %s757_s19 = scalar_lea.hbm %s1071_s3, 4096 }
 0x132   : > { %p754_p4 = scmp.ne.s32.totalorder %s1015_s30, %s753_s10  ;;  %p758_p9 = scmp.lt.u32.totalorder %s1015_s30, %s1071_s3 }
 0x133   : > { %p759_p10 = scmp.lt.u32.totalorder %s757_s19, %s753_s10  ;;  %p761_p12 = scmp.lt.u32.totalorder %s753_s10, %s1015_s30 }
 0x134   : > { %p755_p7 = pnand %p754_p4, %p864_p5 }
 0x135   : > { %p760_p11 = por %p759_p10, %p758_p9 }
 0x136   : > { %p756_p8 = pneg %p755_p7 }
 0x137   : > { %p762_p13 = por %p761_p12, %p760_p11 }
 0x139   : > { %p763_p0 = pnand %p762_p13, %p756_p8 }
 0x13b   : > { %766 = shalt.err (!%p763_p0)
}
 0x13c   : > { %s804_s25 = smov 256   ;;  %s805_s26 = smov 16  }
 0x13d   : > { %650 = dma.vmem_to_hbm [thread:$0]  (%p864_p5), %s1017_s28, 2048, %s1015_s30, %s1027_s4, %s804_s25, %s804_s25, %s805_s26  }
 0x13e PF: > { %p656_p1 = scmp.ge.s32.totalorder %s801_s15, 2  ;;  %s522_s5 = sand.u32 1, %s789_s12  }
 0x13f   : > { %s523_s27 = scalar_lea.sflag [#allocation3], %s522_s5 }
 0x140   : > { %p653_p2 = pnand %p656_p1, %p868_p6 }
 0x142   : > { %784 = dma.done.wait (!%p653_p2), %s523_s27, 2048  }
 0x143   : > { %786 = vsyncadd (!%p653_p2), %s523_s27, 4294965248  ;;  %p13_p3 = scmp.ge.s32.totalorder %s851_s18, 4   ;;  %s1074_s12 = smov %s793_s13 }
 0x144   : > { %s1075_s13 = smov %s797_s14  ;;  %s1076_s14 = smov %s862_s21 }
 0x145   : > { %s1077_s15 = smov %s851_s18  ;;  %15 = sbr.rel (!%p13_p3) target bundleno = 3 (0x3), region = 67 }
 0x14c   :  { %528 = vsyncpa [#allocation3], 1 }
 0x14d   :  { %530 = vsyncpa [#allocation3 + $0x1], 1 }

</bundles_post_ra>
